<compile_context>
chip_gen: v5e
topology: v5e:2x2
jax: 0.10.0
libtpu: 0.0.40
codegen_flags: <defaults>
</compile_context>

<pallas_src>
import functools
import math

import jax
import jax.numpy as jnp
from jax import lax
from jax.experimental import pallas as pl
from jax.experimental.pallas import tpu as pltpu


_MASK_VALUE = -1e10            # matches torch masked_fill(..., -10000000000.0)
_KV_PAD_VALUE = float("-inf")  # structural padding of the key axis (never a real key)


def _round_up(x, m):
    return ((x + m - 1) // m) * m


def _round_down(x, m):
    return max((x // m) * m, m)


def _flash_body(q_ref, k_ref, v_ref, mask_ref, o_ref, m_sc, l_sc, acc_sc, *,
                num_heads, head_dim, kv_len, block_kv, needs_kv_pad,
                exp_dtype, matmul_dtype, exact_normalizer):
    """One (batch, q-block, kv-block) grid step of multi-head online-softmax attention.

    q_ref: (H, tq, D)      k_ref / v_ref: (H, tk, D)   [matmul_dtype, Q pre-scaled]
    mask_ref: (H, tq, tk) bool or None                 o_ref: (tq, H*D)
    scratch: m_sc / l_sc (H, tq, 1) f32, acc_sc (H, tq, D) f32
    """
    H, D = num_heads, head_dim
    ki = pl.program_id(2)

    @pl.when(ki == 0)
    def _init():
        m_sc[...] = jnp.full(m_sc.shape, -jnp.inf, dtype=m_sc.dtype)
        l_sc[...] = jnp.zeros(l_sc.shape, dtype=l_sc.dtype)
        acc_sc[...] = jnp.zeros(acc_sc.shape, dtype=acc_sc.dtype)

    if needs_kv_pad:
        # Structural mask for padded key columns, generated in-kernel from the static true
        # length (zero HBM traffic).  All-False except in the final kv block.
        kv_pos = ki * block_kv + lax.broadcasted_iota(jnp.int32, (1, block_kv), 1)
        kv_pad = kv_pos >= kv_len                         # (1, tk), broadcasts over rows
    else:
        kv_pad = None

    dn_qk = (((1,), (1,)), ((), ()))   # (tq, D) x (tk, D) -> (tq, tk): Q @ K^T, no K^T copy
    dn_pv = (((1,), (0,)), ((), ()))   # (tq, tk) x (tk, D) -> (tq, D)

    def head_body(h, carry):
        qh = q_ref[h]                  # (tq, D), already scaled by 1/sqrt(D)
        kh = k_ref[h]                  # (tk, D)
        s = lax.dot_general(qh, kh, dn_qk, preferred_element_type=jnp.float32)
        if mask_ref is not None:
            s = jnp.where(mask_ref[h], jnp.float32(_MASK_VALUE), s)
        if kv_pad is not None:
            s = jnp.where(kv_pad, jnp.float32(_KV_PAD_VALUE), s)

        m_prev = m_sc[h]                                              # (tq, 1)
        m_new = jnp.maximum(m_prev, jnp.max(s, axis=-1, keepdims=True))
        alpha = jnp.exp(m_prev - m_new)                               # f32, (tq, 1)
        p = jnp.exp((s - m_new).astype(exp_dtype))                    # (tq, tk)
        l_sc[h] = alpha * l_sc[h] + jnp.sum(p.astype(jnp.float32),
                                            axis=-1, keepdims=True)
        acc_sc[h] = alpha * acc_sc[h] + lax.dot_general(
            p.astype(matmul_dtype), v_ref[h], dn_pv,
            preferred_element_type=jnp.float32)
        m_sc[h] = m_new
        return carry

    lax.fori_loop(0, H, head_body, 0)

    @pl.when(ki == pl.num_programs(2) - 1)
    def _finalize():
        # Once per q block: normalize and pack heads back into the lane-dense (tq, H*D)
        # output block, so the HBM writeback stays a dense slab.
        for h in range(H):
            l_h = l_sc[h]
            if exact_normalizer:
                out_h = acc_sc[h] / l_h
            else:
                out_h = acc_sc[h] * pl.reciprocal(l_h, approx=True)   # EUP slot, ~free
            o_ref[:, h * D:(h + 1) * D] = out_h.astype(o_ref.dtype)


def _masked_kernel(q_ref, k_ref, v_ref, mask_ref, o_ref, m_sc, l_sc, acc_sc, **cfg):
    _flash_body(q_ref, k_ref, v_ref, mask_ref, o_ref, m_sc, l_sc, acc_sc, **cfg)


def _plain_kernel(q_ref, k_ref, v_ref, o_ref, m_sc, l_sc, acc_sc, **cfg):
    _flash_body(q_ref, k_ref, v_ref, None, o_ref, m_sc, l_sc, acc_sc, **cfg)


def scaled_dot_product_attention(queries, keys, values, mask=None, *,
                                 block_q=512, block_k=1024,
                                 matmul_dtype=jnp.bfloat16,
                                 exp_dtype=jnp.float32,
                                 exact_normalizer=False):
    """queries/keys/values: (B, T, H, D); mask: (B, H, Tq, Tk) bool (True = masked out).

    Returns (B, Tq, H, D) -- same semantics as the PyTorch module's forward.
    Set matmul_dtype=jnp.float32 and exact_normalizer=True for exact-parity mode.
    """
    B, Tq, H, D = queries.shape
    Tk = keys.shape[1]
    HD = H * D
    out_dtype = queries.dtype

    # ---- tile sizes: always (8,128)-legal; pad instead of a full-extent fallback --------
    if Tq <= block_q:
        tq = _round_up(Tq, 8)
    else:
        tq = _round_down(block_q, 8)
    Tq_pad = _round_up(Tq, tq)

    if Tk <= block_k:
        tk = Tk                         # single kv block; full-extent dims are always legal
    else:
        tk = _round_down(block_k, 128)
    Tk_pad = _round_up(Tk, tk)
    needs_kv_pad = Tk_pad != Tk

    # ---- head-major, pre-scaled, matmul-dtype operands ----------------------------------
    # Scale + dtype cast fuse into the same XLA transpose that builds the head-major layout
    # (no extra HBM pass); bf16 K/V halve the bytes re-streamed once per q block.
    scale = 1.0 / math.sqrt(D)
    q_hm = (jnp.transpose(queries, (0, 2, 1, 3)) * scale).astype(matmul_dtype)
    k_hm = jnp.transpose(keys, (0, 2, 1, 3)).astype(matmul_dtype)
    v_hm = jnp.transpose(values, (0, 2, 1, 3)).astype(matmul_dtype)

    if Tq_pad != Tq:
        q_hm = jnp.pad(q_hm, ((0, 0), (0, 0), (0, Tq_pad - Tq), (0, 0)))
    if needs_kv_pad:
        k_hm = jnp.pad(k_hm, ((0, 0), (0, 0), (0, Tk_pad - Tk), (0, 0)))
        v_hm = jnp.pad(v_hm, ((0, 0), (0, 0), (0, Tk_pad - Tk), (0, 0)))
    if mask is not None:
        mask = mask.astype(jnp.bool_)
        if Tq_pad != Tq or needs_kv_pad:
            mask = jnp.pad(mask, ((0, 0), (0, 0), (0, Tq_pad - Tq), (0, Tk_pad - Tk)))

    grid = (B, Tq_pad // tq, Tk_pad // tk)

    q_spec = pl.BlockSpec((None, H, tq, D), lambda b, qi, ki: (b, 0, qi, 0))
    k_spec = pl.BlockSpec((None, H, tk, D), lambda b, qi, ki: (b, 0, ki, 0))
    v_spec = pl.BlockSpec((None, H, tk, D), lambda b, qi, ki: (b, 0, ki, 0))
    o_spec = pl.BlockSpec((None, tq, HD), lambda b, qi, ki: (b, qi, 0))
    # TODO(synk): when B * (Tq_pad // tq) < 2 (v7x megacore), move the head axis onto the
    # grid as an extra "parallel" dimension instead of looping over heads in-kernel.

    scratch = [
        pltpu.VMEM((H, tq, 1), jnp.float32),   # running max m (last dim lane-pads to 128)
        pltpu.VMEM((H, tq, 1), jnp.float32),   # running sum l
        pltpu.VMEM((H, tq, D), jnp.float32),   # output accumulator
    ]

    # ---- explicit VMEM budget (valid on v7x's 64 MiB as well as v5e/v6e's 128 MiB) ------
    itm = jnp.dtype(matmul_dtype).itemsize
    est = (2 * H * tq * D * itm                       # q block, double-buffered
           + 2 * 2 * H * tk * D * itm                 # k + v blocks
           + (2 * H * tq * tk if mask is not None else 0)
           + 2 * tq * HD * jnp.dtype(out_dtype).itemsize
           + 2 * H * tq * 128 * 4                     # m, l scratch (lane-padded)
           + H * tq * D * 4                           # acc scratch
           + 4 * tq * tk * 4)                         # per-head score/prob temporaries
    vmem_limit = int(min(64 * 2**20, max(32 * 2**20, int(est * 1.5))))

    compiler_params = pltpu.CompilerParams(
        dimension_semantics=("parallel", "parallel", "arbitrary"),
        vmem_limit_bytes=vmem_limit)

    cfg = dict(num_heads=H, head_dim=D, kv_len=Tk, block_kv=tk,
               needs_kv_pad=needs_kv_pad, exp_dtype=exp_dtype,
               matmul_dtype=matmul_dtype, exact_normalizer=exact_normalizer)
    out_shape = jax.ShapeDtypeStruct((B, Tq_pad, HD), out_dtype)

    if mask is not None:
        # TODO(synk): for purely structural masks (causal / key-padding) generate them
        # in-kernel from broadcasted_iota instead of streaming a dense (B,H,Tq,Tk) bool.
        m_spec = pl.BlockSpec((None, H, tq, tk), lambda b, qi, ki: (b, 0, qi, ki))
        out = pl.pallas_call(
            functools.partial(_masked_kernel, **cfg),
            out_shape=out_shape,
            grid_spec=pltpu.PrefetchScalarGridSpec(
                num_scalar_prefetch=0, grid=grid,
                in_specs=[q_spec, k_spec, v_spec, m_spec],
                out_specs=o_spec, scratch_shapes=scratch),
            compiler_params=compiler_params,
        )(q_hm, k_hm, v_hm, mask)
    else:
        out = pl.pallas_call(
            functools.partial(_plain_kernel, **cfg),
            out_shape=out_shape,
            grid_spec=pltpu.PrefetchScalarGridSpec(
                num_scalar_prefetch=0, grid=grid,
                in_specs=[q_spec, k_spec, v_spec],
                out_specs=o_spec, scratch_shapes=scratch),
            compiler_params=compiler_params,
        )(q_hm, k_hm, v_hm)

    out = out[:, :Tq, :]                # drop padded query rows (no-op if unpadded)
    return out.reshape(B, Tq, H, D)     # free contiguous reshape to the torch layout


def _reference(queries, keys, values, mask=None):
    q = jnp.transpose(queries, (0, 2, 1, 3))
    k = jnp.transpose(keys, (0, 2, 1, 3))
    v = jnp.transpose(values, (0, 2, 1, 3))
    s = jnp.einsum("bhqd,bhkd->bhqk", q, k) / jnp.sqrt(jnp.float32(keys.shape[-1]))
    if mask is not None:
        s = jnp.where(mask, _MASK_VALUE, s)
    p = jax.nn.softmax(s, axis=-1)
    o = jnp.einsum("bhqk,bhkd->bhqd", p, v)
    return jnp.transpose(o, (0, 2, 1, 3))


if __name__ == "__main__":
    key = jax.random.PRNGKey(0)
    kq, kk, kv, km = jax.random.split(key, 4)

    # --- small demo shape (matches the module's convention) ---
    B, T, H, D = 2, 8, 4, 32            # H*D = 128 -> lane-dense packed output slab
    queries = jax.random.normal(kq, (B, T, H, D), dtype=jnp.float32)
    keys = jax.random.normal(kk, (B, T, H, D), dtype=jnp.float32)
    values = jax.random.normal(kv, (B, T, H, D), dtype=jnp.float32)
    mask = jax.random.bernoulli(km, p=0.25, shape=(B, H, T, T))

    ref_masked = _reference(queries, keys, values, mask)
    ref_plain = _reference(queries, keys, values, None)

    # Fast path: bf16 MXU operands + approx EUP reciprocal.
    out_masked = jax.block_until_ready(
        scaled_dot_product_attention(queries, keys, values, mask))
    out_plain = jax.block_until_ready(
        scaled_dot_product_attention(queries, keys, values, None))
    assert out_masked.shape == (B, T, H, D)
    assert out_plain.shape == (B, T, H, D)
    assert float(jnp.max(jnp.abs(out_masked - ref_masked))) < 5e-2
    assert float(jnp.max(jnp.abs(out_plain - ref_plain))) < 5e-2

    # Exact-parity path: f32 operands + exact normalizer (review correctness concern).
    out_exact = jax.block_until_ready(
        scaled_dot_product_attention(queries, keys, values, mask,
                                     matmul_dtype=jnp.float32,
                                     exact_normalizer=True))
    assert float(jnp.max(jnp.abs(out_exact - ref_masked))) < 1e-5

    # --- second config: exercises multi-kv-block online softmax, q padding and the
    #     in-kernel iota mask for padded key columns (Tq = Tk = 200 with 128-sized tiles).
    k2 = jax.random.PRNGKey(1)
    kq2, kk2, kv2, km2 = jax.random.split(k2, 4)
    B2, T2, H2, D2 = 1, 200, 2, 64
    q2 = jax.random.normal(kq2, (B2, T2, H2, D2), dtype=jnp.float32)
    k2_ = jax.random.normal(kk2, (B2, T2, H2, D2), dtype=jnp.float32)
    v2_ = jax.random.normal(kv2, (B2, T2, H2, D2), dtype=jnp.float32)
    m2 = jax.random.bernoulli(km2, p=0.25, shape=(B2, H2, T2, T2))

    out2 = jax.block_until_ready(
        scaled_dot_product_attention(q2, k2_, v2_, m2, block_q=128, block_k=128))
    ref2 = _reference(q2, k2_, v2_, m2)
    assert out2.shape == (B2, T2, H2, D2)
    assert float(jnp.max(jnp.abs(out2 - ref2))) < 5e-2

    print("KERNEL_OK")
</pallas_src>

<mosaic_0001>
module attributes {stable_mosaic.version = 11 : i64} {
  func.func @_masked_kernel(%arg0: i32, %arg1: i32, %arg2: i32, %arg3: memref<1x4x8x32xbf16, #tpu.memory_space<vmem>>, %arg4: memref<1x4x8x32xbf16, #tpu.memory_space<vmem>>, %arg5: memref<1x4x8x32xbf16, #tpu.memory_space<vmem>>, %arg6: memref<1x4x8x8xi32, #tpu.memory_space<vmem>>, %arg7: memref<1x8x128xf32, #tpu.memory_space<vmem>>, %arg8: memref<4x8x1xf32, #tpu.memory_space<vmem>>, %arg9: memref<4x8x1xf32, #tpu.memory_space<vmem>>, %arg10: memref<4x8x32xf32, #tpu.memory_space<vmem>>) attributes {dimension_semantics = [#tpu.dimension_semantics<parallel>, #tpu.dimension_semantics<parallel>, #tpu.dimension_semantics<arbitrary>], iteration_bounds = array<i64: 2, 1, 1>, scalar_prefetch = 0 : i64, scratch_operands = 3 : i64, tpu.core_type = #tpu.core_type<tc>, window_params = [{transform_indices = @transform_0, window_bounds = array<i64: 1, 4, 8, 32>}, {transform_indices = @transform_1, window_bounds = array<i64: 1, 4, 8, 32>}, {transform_indices = @transform_2, window_bounds = array<i64: 1, 4, 8, 32>}, {transform_indices = @transform_3, window_bounds = array<i64: 1, 4, 8, 8>}, {transform_indices = @transform_4, window_bounds = array<i64: 1, 8, 128>}]} {
    %c0_i32 = arith.constant 0 : i32
    %0 = arith.cmpi eq, %arg2, %c0_i32 : i32
    %1 = arith.extui %0 : i1 to i32
    %c0_i32_0 = arith.constant 0 : i32
    %2 = arith.cmpi ne, %1, %c0_i32_0 : i32
    scf.if %2 {
      %cst = arith.constant 0xFF800000 : f32
      %7 = vector.broadcast %cst : f32 to vector<4x8x1xf32>
      %c0 = arith.constant 0 : index
      %c0_5 = arith.constant 0 : index
      %c0_6 = arith.constant 0 : index
      %8 = vector.load %arg8[%c0, %c0_5, %c0_6] : memref<4x8x1xf32, #tpu.memory_space<vmem>>, vector<4x8x1xf32>
      tpu.vector_store %arg8[%c0, %c0_5, %c0_6], %7 {strides = array<i32>} : memref<4x8x1xf32, #tpu.memory_space<vmem>>, vector<4x8x1xf32>,
      %cst_7 = arith.constant 0.000000e+00 : f32
      %9 = vector.broadcast %cst_7 : f32 to vector<4x8x1xf32>
      %c0_8 = arith.constant 0 : index
      %c0_9 = arith.constant 0 : index
      %c0_10 = arith.constant 0 : index
      %10 = vector.load %arg9[%c0_8, %c0_9, %c0_10] : memref<4x8x1xf32, #tpu.memory_space<vmem>>, vector<4x8x1xf32>
      tpu.vector_store %arg9[%c0_8, %c0_9, %c0_10], %9 {strides = array<i32>} : memref<4x8x1xf32, #tpu.memory_space<vmem>>, vector<4x8x1xf32>,
      %cst_11 = arith.constant 0.000000e+00 : f32
      %11 = vector.broadcast %cst_11 : f32 to vector<4x8x32xf32>
      %c0_12 = arith.constant 0 : index
      %c0_13 = arith.constant 0 : index
      %c0_14 = arith.constant 0 : index
      %12 = vector.load %arg10[%c0_12, %c0_13, %c0_14] : memref<4x8x32xf32, #tpu.memory_space<vmem>>, vector<4x8x32xf32>
      tpu.vector_store %arg10[%c0_12, %c0_13, %c0_14], %11 {strides = array<i32>} : memref<4x8x32xf32, #tpu.memory_space<vmem>>, vector<4x8x32xf32>,
    } else {
    }
    %c0_i32_1 = arith.constant 0 : i32
    %c4_i32 = arith.constant 4 : i32
    %3 = arith.addi %c0_i32_1, %c4_i32 : i32
    %c1_i32 = arith.constant 1 : i32
    scf.for %arg11 = %c0_i32_1 to %3 step %c1_i32  : i32 {
      %c0 = arith.constant 0 : index
      %7 = arith.index_cast %arg11 : i32 to index
      %c0_5 = arith.constant 0 : index
      %c0_6 = arith.constant 0 : index
      %8 = vector.load %arg3[%c0, %7, %c0_5, %c0_6] : memref<1x4x8x32xbf16, #tpu.memory_space<vmem>>, vector<1x1x8x32xbf16>
      %9 = vector.shape_cast %8 : vector<1x1x8x32xbf16> to vector<8x32xbf16>
      %c0_7 = arith.constant 0 : index
      %10 = arith.index_cast %arg11 : i32 to index
      %c0_8 = arith.constant 0 : index
      %c0_9 = arith.constant 0 : index
      %11 = vector.load %arg4[%c0_7, %10, %c0_8, %c0_9] : memref<1x4x8x32xbf16, #tpu.memory_space<vmem>>, vector<1x1x8x32xbf16>
      %12 = vector.shape_cast %11 : vector<1x1x8x32xbf16> to vector<8x32xbf16>
      %cst = arith.constant dense<0.000000e+00> : vector<8x8xf32>
      %13 = tpu.matmul %9, %12, %cst {dimension_numbers = #tpu.dot_dimension_numbers<[1], [1], [0], [0], [0, 0, 1, 0], [], []>} : vector<8x32xbf16>, vector<8x32xbf16>, vector<8x8xf32> -> vector<8x8xf32>
      %c0_10 = arith.constant 0 : index
      %14 = arith.index_cast %arg11 : i32 to index
      %c0_11 = arith.constant 0 : index
      %c0_12 = arith.constant 0 : index
      %15 = vector.load %arg6[%c0_10, %14, %c0_11, %c0_12] : memref<1x4x8x8xi32, #tpu.memory_space<vmem>>, vector<1x1x8x8xi32>
      %16 = vector.shape_cast %15 : vector<1x1x8x8xi32> to vector<8x8xi32>
      %cst_13 = arith.constant dense<0> : vector<8x8xi32>
      %17 = arith.cmpi ne, %16, %cst_13 : vector<8x8xi32>
      %cst_14 = arith.constant -1.000000e+10 : f32
      %18 = vector.broadcast %cst_14 : f32 to vector<8x8xf32>
      %19 = arith.select %17, %18, %13 : vector<8x8xi1>, vector<8x8xf32>
      %20 = arith.index_cast %arg11 : i32 to index
      %c0_15 = arith.constant 0 : index
      %c0_16 = arith.constant 0 : index
      %21 = vector.load %arg8[%20, %c0_15, %c0_16] : memref<4x8x1xf32, #tpu.memory_space<vmem>>, vector<1x8x1xf32>
      %22 = vector.shape_cast %21 : vector<1x8x1xf32> to vector<8x1xf32>
      %cst_17 = arith.constant dense<0xFF800000> : vector<8xf32>
      %23 = vector.multi_reduction <maximumf>, %19, %cst_17 [1] : vector<8x8xf32> to vector<8xf32>
      %24 = vector.shape_cast %23 : vector<8xf32> to vector<8x1xf32>
      %25 = arith.maximumf %22, %24 : vector<8x1xf32>
      %26 = arith.subf %22, %25 : vector<8x1xf32>
      %27 = math.exp %26 : vector<8x1xf32>
      %28 = vector.broadcast %25 : vector<8x1xf32> to vector<8x8xf32>
      %29 = arith.subf %19, %28 : vector<8x8xf32>
      %30 = math.exp %29 : vector<8x8xf32>
      %31 = arith.index_cast %arg11 : i32 to index
      %c0_18 = arith.constant 0 : index
      %c0_19 = arith.constant 0 : index
      %32 = vector.load %arg9[%31, %c0_18, %c0_19] : memref<4x8x1xf32, #tpu.memory_space<vmem>>, vector<1x8x1xf32>
      %33 = vector.shape_cast %32 : vector<1x8x1xf32> to vector<8x1xf32>
      %34 = arith.mulf %27, %33 : vector<8x1xf32>
      %cst_20 = arith.constant dense<0.000000e+00> : vector<8xf32>
      %35 = vector.multi_reduction <add>, %30, %cst_20 [1] : vector<8x8xf32> to vector<8xf32>
      %36 = vector.shape_cast %35 : vector<8xf32> to vector<8x1xf32>
      %37 = arith.addf %34, %36 : vector<8x1xf32>
      %38 = arith.index_cast %arg11 : i32 to index
      %c0_21 = arith.constant 0 : index
      %c0_22 = arith.constant 0 : index
      %39 = vector.load %arg9[%38, %c0_21, %c0_22] : memref<4x8x1xf32, #tpu.memory_space<vmem>>, vector<1x8x1xf32>
      %40 = vector.shape_cast %39 : vector<1x8x1xf32> to vector<8x1xf32>
      %41 = vector.shape_cast %37 : vector<8x1xf32> to vector<1x8x1xf32>
      tpu.vector_store %arg9[%38, %c0_21, %c0_22], %41 {strides = array<i32>} : memref<4x8x1xf32, #tpu.memory_space<vmem>>, vector<1x8x1xf32>,
      %42 = arith.index_cast %arg11 : i32 to index
      %c0_23 = arith.constant 0 : index
      %c0_24 = arith.constant 0 : index
      %43 = vector.load %arg10[%42, %c0_23, %c0_24] : memref<4x8x32xf32, #tpu.memory_space<vmem>>, vector<1x8x32xf32>
      %44 = vector.shape_cast %43 : vector<1x8x32xf32> to vector<8x32xf32>
      %45 = vector.broadcast %27 : vector<8x1xf32> to vector<8x32xf32>
      %46 = arith.mulf %45, %44 : vector<8x32xf32>
      %47 = arith.truncf %30 : vector<8x8xf32> to vector<8x8xbf16>
      %c0_25 = arith.constant 0 : index
      %48 = arith.index_cast %arg11 : i32 to index
      %c0_26 = arith.constant 0 : index
      %c0_27 = arith.constant 0 : index
      %49 = vector.load %arg5[%c0_25, %48, %c0_26, %c0_27] : memref<1x4x8x32xbf16, #tpu.memory_space<vmem>>, vector<1x1x8x32xbf16>
      %50 = vector.shape_cast %49 : vector<1x1x8x32xbf16> to vector<8x32xbf16>
      %cst_28 = arith.constant dense<0.000000e+00> : vector<8x32xf32>
      %51 = tpu.matmul %47, %50, %cst_28 {dimension_numbers = #tpu.dot_dimension_numbers<[1], [0], [0], [1], [0, 0, 1, 1], [], []>} : vector<8x8xbf16>, vector<8x32xbf16>, vector<8x32xf32> -> vector<8x32xf32>
      %52 = arith.addf %46, %51 : vector<8x32xf32>
      %53 = arith.index_cast %arg11 : i32 to index
      %c0_29 = arith.constant 0 : index
      %c0_30 = arith.constant 0 : index
      %54 = vector.load %arg10[%53, %c0_29, %c0_30] : memref<4x8x32xf32, #tpu.memory_space<vmem>>, vector<1x8x32xf32>
      %55 = vector.shape_cast %54 : vector<1x8x32xf32> to vector<8x32xf32>
      %56 = vector.shape_cast %52 : vector<8x32xf32> to vector<1x8x32xf32>
      tpu.vector_store %arg10[%53, %c0_29, %c0_30], %56 {strides = array<i32>} : memref<4x8x32xf32, #tpu.memory_space<vmem>>, vector<1x8x32xf32>,
      %57 = arith.index_cast %arg11 : i32 to index
      %c0_31 = arith.constant 0 : index
      %c0_32 = arith.constant 0 : index
      %58 = vector.load %arg8[%57, %c0_31, %c0_32] : memref<4x8x1xf32, #tpu.memory_space<vmem>>, vector<1x8x1xf32>
      %59 = vector.shape_cast %58 : vector<1x8x1xf32> to vector<8x1xf32>
      %60 = vector.shape_cast %25 : vector<8x1xf32> to vector<1x8x1xf32>
      tpu.vector_store %arg8[%57, %c0_31, %c0_32], %60 {strides = array<i32>} : memref<4x8x1xf32, #tpu.memory_space<vmem>>, vector<1x8x1xf32>,
    }
    %c4_i32_2 = arith.constant 4 : i32
    %c0_i32_3 = arith.constant 0 : i32
    %4 = arith.cmpi eq, %arg2, %c0_i32_3 : i32
    %5 = arith.extui %4 : i1 to i32
    %c0_i32_4 = arith.constant 0 : i32
    %6 = arith.cmpi ne, %5, %c0_i32_4 : i32
    scf.if %6 {
      %c0 = arith.constant 0 : index
      %c0_5 = arith.constant 0 : index
      %c0_6 = arith.constant 0 : index
      %7 = vector.load %arg9[%c0, %c0_5, %c0_6] : memref<4x8x1xf32, #tpu.memory_space<vmem>>, vector<1x8x1xf32>
      %8 = vector.shape_cast %7 : vector<1x8x1xf32> to vector<8x1xf32>
      %c0_7 = arith.constant 0 : index
      %c0_8 = arith.constant 0 : index
      %c0_9 = arith.constant 0 : index
      %9 = vector.load %arg10[%c0_7, %c0_8, %c0_9] : memref<4x8x32xf32, #tpu.memory_space<vmem>>, vector<1x8x32xf32>
      %10 = vector.shape_cast %9 : vector<1x8x32xf32> to vector<8x32xf32>
      %11 = tpu.reciprocal %8 {approx = true} : vector<8x1xf32> -> vector<8x1xf32>
      %12 = vector.broadcast %11 : vector<8x1xf32> to vector<8x32xf32>
      %13 = arith.mulf %10, %12 : vector<8x32xf32>
      %c0_10 = arith.constant 0 : index
      %c0_11 = arith.constant 0 : index
      %c0_12 = arith.constant 0 : index
      %14 = vector.load %arg7[%c0_10, %c0_11, %c0_12] : memref<1x8x128xf32, #tpu.memory_space<vmem>>, vector<1x8x32xf32>
      %15 = vector.shape_cast %14 : vector<1x8x32xf32> to vector<8x32xf32>
      %16 = vector.shape_cast %13 : vector<8x32xf32> to vector<1x8x32xf32>
      tpu.vector_store %arg7[%c0_10, %c0_11, %c0_12], %16 {strides = array<i32>} : memref<1x8x128xf32, #tpu.memory_space<vmem>>, vector<1x8x32xf32>,
      %c1 = arith.constant 1 : index
      %c0_13 = arith.constant 0 : index
      %c0_14 = arith.constant 0 : index
      %17 = vector.load %arg9[%c1, %c0_13, %c0_14] : memref<4x8x1xf32, #tpu.memory_space<vmem>>, vector<1x8x1xf32>
      %18 = vector.shape_cast %17 : vector<1x8x1xf32> to vector<8x1xf32>
      %c1_15 = arith.constant 1 : index
      %c0_16 = arith.constant 0 : index
      %c0_17 = arith.constant 0 : index
      %19 = vector.load %arg10[%c1_15, %c0_16, %c0_17] : memref<4x8x32xf32, #tpu.memory_space<vmem>>, vector<1x8x32xf32>
      %20 = vector.shape_cast %19 : vector<1x8x32xf32> to vector<8x32xf32>
      %21 = tpu.reciprocal %18 {approx = true} : vector<8x1xf32> -> vector<8x1xf32>
      %22 = vector.broadcast %21 : vector<8x1xf32> to vector<8x32xf32>
      %23 = arith.mulf %20, %22 : vector<8x32xf32>
      %c0_18 = arith.constant 0 : index
      %c0_19 = arith.constant 0 : index
      %c32 = arith.constant 32 : index
      %24 = vector.load %arg7[%c0_18, %c0_19, %c32] : memref<1x8x128xf32, #tpu.memory_space<vmem>>, vector<1x8x32xf32>
      %25 = vector.shape_cast %24 : vector<1x8x32xf32> to vector<8x32xf32>
      %26 = vector.shape_cast %23 : vector<8x32xf32> to vector<1x8x32xf32>
      tpu.vector_store %arg7[%c0_18, %c0_19, %c32], %26 {strides = array<i32>} : memref<1x8x128xf32, #tpu.memory_space<vmem>>, vector<1x8x32xf32>,
      %c2 = arith.constant 2 : index
      %c0_20 = arith.constant 0 : index
      %c0_21 = arith.constant 0 : index
      %27 = vector.load %arg9[%c2, %c0_20, %c0_21] : memref<4x8x1xf32, #tpu.memory_space<vmem>>, vector<1x8x1xf32>
      %28 = vector.shape_cast %27 : vector<1x8x1xf32> to vector<8x1xf32>
      %c2_22 = arith.constant 2 : index
      %c0_23 = arith.constant 0 : index
      %c0_24 = arith.constant 0 : index
      %29 = vector.load %arg10[%c2_22, %c0_23, %c0_24] : memref<4x8x32xf32, #tpu.memory_space<vmem>>, vector<1x8x32xf32>
      %30 = vector.shape_cast %29 : vector<1x8x32xf32> to vector<8x32xf32>
      %31 = tpu.reciprocal %28 {approx = true} : vector<8x1xf32> -> vector<8x1xf32>
      %32 = vector.broadcast %31 : vector<8x1xf32> to vector<8x32xf32>
      %33 = arith.mulf %30, %32 : vector<8x32xf32>
      %c0_25 = arith.constant 0 : index
      %c0_26 = arith.constant 0 : index
      %c64 = arith.constant 64 : index
      %34 = vector.load %arg7[%c0_25, %c0_26, %c64] : memref<1x8x128xf32, #tpu.memory_space<vmem>>, vector<1x8x32xf32>
      %35 = vector.shape_cast %34 : vector<1x8x32xf32> to vector<8x32xf32>
      %36 = vector.shape_cast %33 : vector<8x32xf32> to vector<1x8x32xf32>
      tpu.vector_store %arg7[%c0_25, %c0_26, %c64], %36 {strides = array<i32>} : memref<1x8x128xf32, #tpu.memory_space<vmem>>, vector<1x8x32xf32>,
      %c3 = arith.constant 3 : index
      %c0_27 = arith.constant 0 : index
      %c0_28 = arith.constant 0 : index
      %37 = vector.load %arg9[%c3, %c0_27, %c0_28] : memref<4x8x1xf32, #tpu.memory_space<vmem>>, vector<1x8x1xf32>
      %38 = vector.shape_cast %37 : vector<1x8x1xf32> to vector<8x1xf32>
      %c3_29 = arith.constant 3 : index
      %c0_30 = arith.constant 0 : index
      %c0_31 = arith.constant 0 : index
      %39 = vector.load %arg10[%c3_29, %c0_30, %c0_31] : memref<4x8x32xf32, #tpu.memory_space<vmem>>, vector<1x8x32xf32>
      %40 = vector.shape_cast %39 : vector<1x8x32xf32> to vector<8x32xf32>
      %41 = tpu.reciprocal %38 {approx = true} : vector<8x1xf32> -> vector<8x1xf32>
      %42 = vector.broadcast %41 : vector<8x1xf32> to vector<8x32xf32>
      %43 = arith.mulf %40, %42 : vector<8x32xf32>
      %c0_32 = arith.constant 0 : index
      %c0_33 = arith.constant 0 : index
      %c96 = arith.constant 96 : index
      %44 = vector.load %arg7[%c0_32, %c0_33, %c96] : memref<1x8x128xf32, #tpu.memory_space<vmem>>, vector<1x8x32xf32>
      %45 = vector.shape_cast %44 : vector<1x8x32xf32> to vector<8x32xf32>
      %46 = vector.shape_cast %43 : vector<8x32xf32> to vector<1x8x32xf32>
      tpu.vector_store %arg7[%c0_32, %c0_33, %c96], %46 {strides = array<i32>} : memref<1x8x128xf32, #tpu.memory_space<vmem>>, vector<1x8x32xf32>,
    } else {
    }
    return
  }
  func.func @transform_0(%arg0: i32, %arg1: i32, %arg2: i32) -> (i32, i32, i32, i32) {
    %c0_i32 = arith.constant 0 : i32
    %c0_i32_0 = arith.constant 0 : i32
    %c0_i32_1 = arith.constant 0 : i32
    return %arg0, %c0_i32, %arg1, %c0_i32_0 : i32, i32, i32, i32
  }
  func.func @transform_1(%arg0: i32, %arg1: i32, %arg2: i32) -> (i32, i32, i32, i32) {
    %c0_i32 = arith.constant 0 : i32
    %c0_i32_0 = arith.constant 0 : i32
    %c0_i32_1 = arith.constant 0 : i32
    return %arg0, %c0_i32, %arg2, %c0_i32_0 : i32, i32, i32, i32
  }
  func.func @transform_2(%arg0: i32, %arg1: i32, %arg2: i32) -> (i32, i32, i32, i32) {
    %c0_i32 = arith.constant 0 : i32
    %c0_i32_0 = arith.constant 0 : i32
    %c0_i32_1 = arith.constant 0 : i32
    return %arg0, %c0_i32, %arg2, %c0_i32_0 : i32, i32, i32, i32
  }
  func.func @transform_3(%arg0: i32, %arg1: i32, %arg2: i32) -> (i32, i32, i32, i32) {
    %c0_i32 = arith.constant 0 : i32
    %c0_i32_0 = arith.constant 0 : i32
    return %arg0, %c0_i32, %arg1, %arg2 : i32, i32, i32, i32
  }
  func.func @transform_4(%arg0: i32, %arg1: i32, %arg2: i32) -> (i32, i32, i32) {
    %c0_i32 = arith.constant 0 : i32
    %c0_i32_0 = arith.constant 0 : i32
    return %arg0, %arg1, %c0_i32 : i32, i32, i32
  }
}

</mosaic_0001>

<bundles_post_ra>
// kernel: tpu_custom_call.1
= control target key start
LH: loop header
LB: loop body
LE: loop exit
PB: predicated region body
PF: predicated region fallthrough
CT: control target
= control target key end

     0   :  { %9 = vsyncpa [#allocation6], 0  ;;  %s1180_s0 = inlined_call_operand.vmem [shape: bf16[2,4,8,32], index: 0, kind: input, shape index: {}]   ;;  %s1181_s1 = inlined_call_operand.vmem [shape: bf16[2,4,8,32], index: 1, kind: input, shape index: {}]   ;;  %s1182_s2 = inlined_call_operand.hbm [shape: bf16[2,4,8,32], index: 2, kind: input, shape index: {}]   ;;  %s1183_s3 = inlined_call_operand.vmem [shape: s32[2,4,8,8], index: 3, kind: input, shape index: {}]   ;;  %s1184_s4 = inlined_call_operand.hbm [shape: f32[2,8,128], index: 4, kind: output, shape index: {}]  }
   0x1   :  { %11 = vsyncpa [#allocation6 + $0x1], 0 }
   0x2   :  { %12 = vsyncpa [#allocation7], 0 }
   0x3   :  { %14 = vsyncpa [#allocation7 + $0x1], 0  ;;  %s987_s15 = smov 0   ;;  %s989_s16 = smov 0  }
   0x4   :  { %s991_s17 = smov 0   ;;  %s993_s18 = smov 0  }
   0x5   :  { %s995_s19 = smov 0   ;;  %s997_s20 = smov 0  }
   0x6 LB: > { %s706_s21 = sadd.s32 4294967295, %s947_s20   ;;  %s707_s22 = sadd.s32 4294967294, %s947_s20   ;;  %s947_s20 = sphi %s997_s20, %s20_s20   ;;  %s943_s19 = sphi %s995_s19, %s1193_s19   ;;  %s939_s18 = sphi %s993_s18, %s1192_s18   ;;  %s935_s17 = sphi %s991_s17, %s1191_s17   ;;  %s931_s16 = sphi %s989_s16, %s1190_s16   ;;  %s927_s15 = sphi %s987_s15, %s1189_s15  }
   0x7   : > { %s39_s23 = sadd.s32 1, %s943_s19  ;;  %s104_s24 = sadd.s32 1, %s935_s17 }
   0x8   : > { %p41_p0 = scmp.ge.s32.totalorder %s39_s23, 2  ;;  %p111_p1 = scmp.ne.s32.totalorder %s935_s17, %s931_s16 }
   0x9   : > { %p112_p2 = scmp.eq.s32.totalorder %s947_s20, 0  ;;  %p117_p3 = scmp.ne.s32.totalorder %s931_s16, %s927_s15 }
   0xa   : > { %s1195_s23 = smov (%p41_p0, %s39_s23), 0  ;;  %p118_p5 = scmp.eq.s32.totalorder %s706_s21, 0 }
   0xb   : > { %p1028_p4 = por %p112_p2, %p111_p1  ;;  %s99_s26 = ssub.s32 %s943_s19, %s1195_s23 }
   0xc   : > { %p173_p6 = scmp.eq.s32.totalorder %s706_s21, 1  ;;  %p102_p7 = scmp.eq.s32.totalorder %s99_s26, 0 }
   0xd   : > { %p1034_p8 = por %p118_p5, %p117_p3  ;;  %p179_p10 = scmp.eq.s32.totalorder %s707_s22, 1 }
   0xe   : > { %p1038_p9 = por %p173_p6, %p111_p1  ;;  %p709_p12 = scmp.ge.s32.totalorder %s947_s20, 2 }
   0xf   : > { %s1043_s29 = scalar_select %p102_p7, %s935_s17, %s104_s24  }
  0x10   : > { %p1045_p11 = por %p179_p10, %p117_p3  ;;  %p748_p13 = scmp.lt.s32.totalorder %s947_s20, 2 }
  0x11   : > { %s221_s5 = sand.u32 1, %s935_s17   ;;  %s732_s7 = sshll.u32 %s943_s19, 4 }
  0x12   : > { %s710_s6 = sshll.u32 %s221_s5, 4  ;;  %s231_s10 = scalar_lea.hbm %s1182_s2, %s732_s7 }
  0x13   : > { %s225_s11 = scalar_lea.vmem [#allocation5], %s710_s6  ;;  %s232_s13 = sshll.u32 %s231_s10, 4  ;;  %s233_s13 = int_to_ptr.hbm [resolvable:$true] %s232_s13 }
  0x14   : > { %s234_s12 = sshll.u32 %s225_s11, 4  ;;  %p741_p0 = pnand %p748_p13, %p1028_p4  ;;  %s235_s12 = int_to_ptr.vmem [resolvable:$true] %s234_s12 }
  0x15   : > { %p713_p1 = scmp.ge.s32.totalorder %s947_s20, 1  ;;  %s222_s14 = scalar_lea.sflag [#allocation6], %s221_s5 }
  0x16   : > { %s953_s21 = smov 64   ;;  %s954_s22 = smov 4  }
  0x17   : > { %743 = dma.hbm_to_vmem [thread:$0]  (!%p741_p0), %s233_s13, 256, %s235_s12, %s222_s14, %s953_s21, %s953_s21, %s954_s22  }
  0x18   : > { %p256_p2 = scmp.lt.s32.totalorder %s947_s20, 3 }
  0x1a   : > { %p257_p3 = pnand %p713_p1, %p256_p2 }
  0x1b   : > { %s1061_s24 = sand.u32 (!%p257_p3), 1, %s931_s16  }
  0x1c   : > { %260 = sbr.rel (%p257_p3) target bundleno = 799 (0x31f), region = 36  ;;  %s714_s26 = sshll.u32 (!%p257_p3), %s1061_s24, 4 }
  0x1d   : > { %s263_s6 = scalar_lea.sflag (!%p257_p3), [#allocation6], %s1061_s24  ;;  %s1065_s7 = scalar_lea.vmem (!%p257_p3), [#allocation5], %s714_s26 }
  0x21   : > { %918 = dma.done.wait (%p1034_p8), %s263_s6, 256  }
  0x22   : > { %920 = vsyncadd (%p1034_p8), %s263_s6, 4294967040  ;;  %s715_s25 = sshll.u32 %s1061_s24, 3  ;;  %p319_p4 = scmp.lt.s32.totalorder %s939_s18, 1  ;;  %vm351_vm0 = vcmask 7168   ;;  %v955_v0 = vmov -inf   ;;  %v956_v1 = vmov 0.0  }
  0x23   : > { %352 = vst.msk [vmem:[#allocation2] sm:$0xff] %vm351_vm0, %v955_v0  ;;  %vm360_vm1 = vcmask 261120   ;;  %s1101_s6 = scalar_lea.vmem [#allocation8], %s715_s25 }
  0x24   : > { %s320_s5 = scalar_select %p319_p4, %s939_s18, 1  ;;  %353 = vst.msk [vmem:[#allocation2 + $0x8] sm:$0xff] %vm351_vm0, %v955_v0 }
  0x25   : > { %354 = vst.msk [vmem:[#allocation2 + $0x10] sm:$0xff] %vm351_vm0, %v955_v0 }
  0x26   : > { %s733_s8 = sshll.u32 %s320_s5, 4  ;;  %s735_s9 = sshll.u32 %s320_s5, 5  ;;  %355 = vst.msk [vmem:[#allocation2 + $0x18] sm:$0xff] %vm351_vm0, %v955_v0 }
  0x27   : > { %s1081_s11 = scalar_lea.vmem %s1180_s0, %s733_s8  ;;  %s1086_s14 = scalar_lea.vmem %s1181_s1, %s733_s8  ;;  %356 = vst.msk [vmem:[#allocation3] sm:$0xff] %vm351_vm0, %v956_v1 }
  0x28   : > { %s1092_s26 = scalar_lea.vmem %s1183_s3, %s735_s9  ;;  %357 = vst.msk [vmem:[#allocation3 + $0x8] sm:$0xff] %vm351_vm0, %v956_v1  ;;  %s1103_s5 = smov 0  }
  0x29   : > { %358 = vst.msk [vmem:[#allocation3 + $0x10] sm:$0xff] %vm351_vm0, %v956_v1 }
  0x2a   : > { %359 = vst.msk [vmem:[#allocation3 + $0x18] sm:$0xff] %vm351_vm0, %v956_v1 }
  0x2b   : > { %361 = vst.msk [vmem:[#allocation4] sm:$0xff] %vm360_vm1, %v956_v1 }
  0x2c   : > { %362 = vst.msk [vmem:[#allocation4 + $0x8] sm:$0xff] %vm360_vm1, %v956_v1 }
  0x2d   : > { %363 = vst.msk [vmem:[#allocation4 + $0x10] sm:$0xff] %vm360_vm1, %v956_v1 }
  0x2e   : > { %364 = vst.msk [vmem:[#allocation4 + $0x18] sm:$0xff] %vm360_vm1, %v956_v1 }
  0x2f LB: >> { %s1109_s8 = sshll.u32 %s951_s5, 2  ;;  %s1118_s27 = sshll.u32 %s951_s5, 3  ;;  %vm404_vm3 = vcmask 64512   ;;  %v957_v10 = vmov 0   ;;  %vm444_vm4 = vcmask 1043456   ;;  %s951_s5 = sphi %s1103_s5, %s370_s5  }
  0x30   : >> { %s375_s9 = scalar_lea.vmem %s1086_s14, %s1109_s8  ;;  %s372_s25 = scalar_lea.vmem %s1081_s11, %s1109_s8  ;;  %815 = vset.pattern.permute.xlu0 %v957_v10  ;;  %816 = vset.pattern.permute.xlu1 %v957_v10 }
  0x31   : >> { %v376_v2 = vld [vmem:[%s375_s9] sm:$0xf]  ;;  %s398_s10 = scalar_lea.vmem %s1092_s26, %s1118_s27  ;;  %s402_s12 = scalar_lea.vmem [#allocation2], %s1118_s27 }
  0x32   : >> { %v382_v3 = vsel %vm360_vm1, %v376_v2, 0  ;;  %v373_v4 = vld [vmem:[%s372_s25] sm:$0xf]  ;;  %s439_s13 = scalar_lea.vmem %s1065_s7, %s1109_s8 [#allocation5]  ;;  %s420_s21 = scalar_lea.vmem [#allocation3], %s1118_s27 }
  0x33   : >> { %391 = vmatpush.bf16.xpose.msra.mxu0 %v382_v3  ;;  %v399_v5 = vld [vmem:[%s398_s10] sm:$0xff]  ;;  %s429_s22 = scalar_lea.vmem [#allocation4], %s1118_s27  ;;  %s370_s5 = sadd.s32 1, %s951_s5  }
  0x34   : >> { %vm400_vm2 = vcmp.ne.s32.totalorder %v399_v5, 0  ;;  %v403_v11 = vld [vmem:[%s402_s12] sm:$0xff]  ;;  %p367_p5 = scmp.ge.s32.totalorder %s370_s5, 4  }
  0x35   : >> { %v440_v17 = vld [vmem:[%s439_s13] sm:$0xf]  ;;  %v958_v37 = vmov (%p367_p5), 0   ;;  %s959_s7 = smov (%p367_p5), 96   ;;  %s960_s11 = smov (%p367_p5), 32   ;;  %vm493_vm5 = vcmask (%p367_p5), 523520  }
  0x36   : >> { %v446_v18 = vsel %vm444_vm4, %v440_v17, 0  ;;  %v421_v26 = vld [vmem:[%s420_s21] sm:$0xff]  ;;  %s961_s14 = smov (%p367_p5), 64   ;;  %vm510_vm6 = vcmask (%p367_p5), 785920   ;;  %s729_s26 = sshll.u32 (%p367_p5), %s939_s18, 3  ;;  %vm527_vm7 = vcmask (%p367_p5), 1048320  }
  0x37   : >> { %455 = vmatpush.bf16.msra.mxu1 %v446_v18  ;;  %v430_v30 = vld [vmem:[%s429_s22] sm:$0xff]  ;;  %s541_s9 = scalar_lea.hbm (%p367_p5), %s1184_s4, %s729_s26  ;;  %s543_s25 = sshll.u32 (%p367_p5), %s1101_s6, 4  ;;  %s544_s25 = int_to_ptr.vmem [resolvable:$true] %s543_s25 }
  0x38   : > { %s545_s27 = sshll.u32 (%p367_p5), %s541_s9, 4  ;;  %s530_s10 = scalar_lea.sflag (%p367_p5), [#allocation7], %s1061_s24  ;;  %s546_s27 = int_to_ptr.hbm [resolvable:$true] %s545_s27 }
  0x3a   : >> { %724 = vmatmul.msk.bf16.vlgmr.msra.gmra.mxu0 %vm360_vm1, %v373_v4 }
  0xb7   : >> { %v393_v6 = vpop.f32.mrf.mxu0 }
  0xb8   : >> { %v401_v7 = vsel %vm400_vm2, -1e+10, %v393_v6 }
  0xb9   : >> { %v405_v8 = vsel %vm404_vm3, %v401_v7, -inf }
  0xba   : >> { %406 = vmax.xlane.f32.xlu0 %v405_v8 }
  0xbf   : >> { %v395_v9 = vpop.f32.mrf.mxu0 }
 0x12d   : >> { %v407_v12 = vpop.xlane.xlu0 %406 }
 0x12e   : >> { %v408_v13 = vmax.f32 %v403_v11, %v407_v12 }
 0x130   : >> { %v409_v14 = vsub.f32 %v403_v11, %v408_v13  ;;  %463 = vst.msk [vmem:[%s402_s12] sm:$0xff] %vm351_vm0, %v408_v13  ;;  %414 = vperm.xlu0 %815, %v408_v13   ;;  %s875_s12 = sshra.s32 (%p367_p5), %s546_s27, 4  ;;  %s876_s12 = int_to_ptr.hbm [resolvable:$true] %s875_s12 }
 0x131   : > { %s877_s13 = scalar_lea.hbm (%p367_p5), %s876_s12, 8  ;;  %p882_p10 = scmp.lt.s32.totalorder (%p367_p5), %s876_s12, %s1184_s4 }
 0x132   : >> { %v410_v15 = vmul.f32 1.442695, %v409_v14  ;;  %p878_p6 = scmp.ne.s32.totalorder (%p367_p5), %s876_s12, %s877_s13 }
 0x134   : >> { %817 = vpow2.f32 %v410_v15  ;;  %p879_p7 = pnand (%p367_p5), %p878_p6, %p1038_p9 }
 0x136   : > { %p880_p8 = pneg (%p367_p5), %p879_p7 }
 0x138   : > { %821 = vset.pattern.permute.xlu0 (%p367_p5), %v958_v37 }
 0x13a   : >> { %v818_v16 = vpop.eup %817 }
 0x13b   : >> { %433 = vperm.xlu1 %816, %v818_v16   ;;  %v422_v27 = vmul.f32 %v818_v16, %v421_v26 }
 0x143   : > { %822 = vset.pattern.permute.xlu1 (%p367_p5), %v958_v37 }
 0x1a2   : >> { %v415_v19 = vpop.permute.xlu0 %414 }
 0x1a3   : >> { %v417_v20 = vsub.f32 %v401_v7, %v415_v19 }
 0x1a5   : >> { %v418_v21 = vmul.f32 1.442695, %v417_v20 }
 0x1a7   : >> { %819 = vpow2.f32 %v418_v21 }
 0x1ad   : >> { %v820_v22 = vpop.eup %819  ;;  %v434_v25 = vpop.permute.xlu1 %433 }
 0x1ae   : >> { %v423_v23 = vsel %vm404_vm3, %v820_v22, 0.0  ;;  %v437_v24 = vpack.c.bf16 %v820_v22, %v820_v22  ;;  %v436_v31 = vmul.f32 %v434_v25, %v430_v30 }
 0x1af   : >> { %424 = vadd.xlane.f32.xlu1 %v423_v23 }
 0x1b0   : >> { %727 = vmatmul.msk.bf16.vlgmr.msra.gmra.mxu1 %vm404_vm3, %v437_v24 }
 0x222   : >> { %v425_v28 = vpop.xlane.xlu1 %424 }
 0x223   : >> { %v426_v29 = vadd.f32 %v425_v28, %v422_v27 }
 0x225   : >> { %428 = vst.msk [vmem:[%s420_s21] sm:$0xff] %vm351_vm0, %v426_v29 }
 0x22c   : > { %v513_v35 = vld [vmem:[#allocation3 + $0x18] sm:$0xff] (%p367_p5)  ;;  %v479_v36 = vld [vmem:[#allocation3 + $0x8] sm:$0xff] (%p367_p5)  ;;  %v467_v38 = vld [vmem:[#allocation3] sm:$0xff] (%p367_p5) }
 0x22d   : >> { %v457_v32 = vpop.f32.mrf.mxu1  ;;  %823 = vrcp.f32 (%p367_p5), %v513_v35  ;;  %v496_v39 = vld [vmem:[#allocation3 + $0x10] sm:$0xff] (%p367_p5) }
 0x22e   : >> { %v461_v33 = vadd.f32 %v457_v32, %v436_v31  ;;  %825 = vrcp.f32 (%p367_p5), %v479_v36 }
 0x22f   : > { %827 = vrcp.f32 (%p367_p5), %v467_v38 }
 0x230   : >> { %462 = vst.msk [vmem:[%s429_s22] sm:$0xff] %vm360_vm1, %v461_v33  ;;  %829 = vrcp.f32 (%p367_p5), %v496_v39  ;;  %s881_s22 = scalar_lea.hbm (%p367_p5), %s1184_s4, 16 }
 0x231   : > { %369 = sbr.rel (!%p367_p5) target bundleno = 47 (0x2f), region = 118  ;;  %p883_p13 = scmp.lt.s32.totalorder (%p367_p5), %s881_s22, %s877_s13 }
 0x233   : > { %v824_v40 = vpop.eup (%p367_p5), %823  ;;  %p884_p0 = por (%p367_p5), %p883_p13, %p882_p10 }
 0x234   : > { %v826_v41 = vpop.eup (%p367_p5), %825  ;;  %519 = vperm.xlu1 (%p367_p5), %822, %v824_v40  }
 0x235   : >> { %v459_v34 = vpop.f32.mrf.mxu1  ;;  %485 = vperm.xlu0 (%p367_p5), %821, %v826_v41   ;;  %v828_v42 = vpop.eup (%p367_p5), %827  ;;  %p885_p1 = pnand (%p367_p5), %p884_p0, %p880_p8 }
 0x236   : > { %v830_v43 = vpop.eup %829 }
 0x237   : > { %v515_v44 = vld [vmem:[#allocation4 + $0x18] sm:$0xff]  ;;  %v481_v45 = vld [vmem:[#allocation4 + $0x8] sm:$0xff]  ;;  %v468_v50 = vld [vmem:[#allocation4] sm:$0xff] }
 0x238   : > { %v498_v51 = vld [vmem:[#allocation4 + $0x10] sm:$0xff] }
 0x23c   : > { %472 = vperm.xlu1 %822, %v828_v42  }
 0x23d   : > { %502 = vperm.xlu0 %821, %v830_v43  }
 0x2a6   : > { %v520_v46 = vpop.permute.xlu1 %519 }
 0x2a7   : > { %v522_v47 = vmul.f32 %v520_v46, %v515_v44  ;;  %v486_v48 = vpop.permute.xlu0 %485 }
 0x2a8   : > { %v488_v49 = vmul.f32 %v486_v48, %v481_v45 }
 0x2a9   : > { %524 = vrot.lane.b32.xlu0 %v522_v47, %s959_s7 }
 0x2aa   : > { %490 = vrot.lane.b32.xlu2 %v488_v49, %s960_s11 }
 0x2ae   : > { %v473_v52 = vpop.permute.xlu1 %472 }
 0x2af   : > { %v475_v53 = vmul.f32 %v473_v52, %v468_v50  ;;  %v503_v54 = vpop.permute.xlu0 %502 }
 0x2b0   : > { %v505_v55 = vmul.f32 %v503_v54, %v498_v51 }
 0x2b1   : > { %477 = vst.msk [vmem:[%s1101_s6] sm:$0xff] %vm360_vm1, %v475_v53 }
 0x2b2   : > { %507 = vrot.lane.b32.xlu2 %v505_v55, %s961_s14 }
 0x304   : > { %v491_v56 = vpop.permute.xlu2 %490 }
 0x305   : > { %494 = vst.msk [vmem:[%s1101_s6] sm:$0xff] %vm493_vm5, %v491_v56 }
 0x30c   : > { %v508_v57 = vpop.permute.xlu2 %507 }
 0x30d   : > { %511 = vst.msk [vmem:[%s1101_s6] sm:$0xff] %vm510_vm6, %v508_v57 }
 0x31b   : > { %v525_v58 = vpop.permute.xlu0 %524 }
 0x31c   : > { %528 = vst.msk [vmem:[%s1101_s6] sm:$0xff] %vm527_vm7, %v525_v58 }
 0x31d   : > { %888 = shalt.err (!%p885_p1)
}
 0x31e   : > { %738 = dma.vmem_to_hbm [thread:$0]  (%p1038_p9), %s544_s25, 128, %s546_s27, %s530_s10  }
 0x31f PF: > { %s557_s24 = sand.u32 1, %s927_s15   ;;  %p745_p2 = pnand %p709_p12, %p1045_p11 }
 0x320   : > { %s558_s6 = scalar_lea.sflag [#allocation7], %s557_s24 }
 0x321   : > { %p746_p3 = pneg %p745_p2 }
 0x323   : > { %922 = dma.done.wait (%p746_p3), %s558_s6, 128  }
 0x324   : > { %924 = vsyncadd (%p746_p3), %s558_s6, 4294967168  ;;  %s20_s20 = sadd.s32 1, %s947_s20   ;;  %s1189_s15 = smov %s931_s16 }
 0x325   : > { %p17_p4 = scmp.ge.s32.totalorder %s20_s20, 4   ;;  %s1190_s16 = smov %s935_s17 }
 0x326   : > { %s1191_s17 = smov %s1043_s29  ;;  %s1192_s18 = smov %s943_s19 }
 0x327   : > { %s1193_s19 = smov %s1195_s23  ;;  %19 = sbr.rel (!%p17_p4) target bundleno = 6 (0x6), region = 129 }
 0x32c   :  { %564 = vsyncpa [#allocation6], 1 }
 0x32d   :  { %566 = vsyncpa [#allocation6 + $0x1], 1 }
 0x32e   :  { %567 = vsyncpa [#allocation7], 1 }
 0x32f   :  { %569 = vsyncpa [#allocation7 + $0x1], 1 }

</bundles_post_ra>
